<compile_context>
chip_gen: v6e
topology: v6e:2x2x1
jax: 0.10.0
libtpu: 0.0.40
codegen_flags: <defaults>
</compile_context>

<pallas_src>
import jax
import jax.numpy as jnp
from jax.experimental import pallas as pl
from jax.experimental.pallas import tpu as pltpu

BN_EPS = 1e-5
LANES = 128
_VMEM_BUDGET = 24 * 1024 * 1024   # conservative working-set cap (v7x-safe)
_VMEM_LIMIT = 32 * 1024 * 1024    # scoped VMEM limit, valid on v5e/v6e/v7x


def _round_up(x, m):
    return ((x + m - 1) // m) * m


def _linear_bn_kernel(x_ref, w_ref, b_ref, o_ref):
    """o = x @ W_folded_packed + b_folded_packed on one lane-dense row tile."""
    x = x_ref[...].astype(w_ref.dtype)              # bf16 MXU operands
    y = jnp.dot(x, w_ref[...], preferred_element_type=jnp.float32)
    o_ref[...] = (y + b_ref[...]).astype(o_ref.dtype)


def _fold_bn(w, b, gamma, beta, mean, var):
    """Fold eval-mode BatchNorm1d into the preceding Linear."""
    scale = gamma * jax.lax.rsqrt(var + BN_EPS)
    return w * scale[None, :], (b - mean) * scale + beta


def _pick_pack(d_out):
    """How many output rows get packed into one 128-lane output row."""
    if d_out < LANES and LANES % d_out == 0:
        return LANES // d_out
    return 1  # d_out >= 128 (already lane-dense) or awkward width: no packing


def _pack_linear_params(w_folded, b_folded, pack, compute_dtype):
    """Block-diagonal weight / tiled bias so the matmul emits packed rows."""
    d_in, d_out = w_folded.shape
    if pack == 1:
        w_pack = w_folded
        b_pack = b_folded.reshape(1, d_out)
    else:
        eye = jnp.eye(pack, dtype=w_folded.dtype)
        w_pack = jnp.kron(eye, w_folded)             # (pack*d_in, pack*d_out)
        b_pack = jnp.tile(b_folded, (pack,)).reshape(1, pack * d_out)
    return w_pack.astype(compute_dtype), b_pack.astype(jnp.float32)


def packed_linear_bn(x, w_pack, b_pack, d_out, pack, *, tile_rows=1024):
    """y = x @ W_folded + b_folded via a row-packed, lane-dense Pallas matmul.

    x      : (M, d_in)                 float32 or bfloat16
    w_pack : (pack*d_in, pack*d_out)   block-diagonal folded weight
    b_pack : (1, pack*d_out)           folded bias (tiled), float32
    returns: (M, d_out)                float32
    """
    m, _ = x.shape
    in_lanes, out_lanes = w_pack.shape

    # Rows must be divisible by the pack factor (free when already true).
    m_pad = _round_up(m, pack)
    if m_pad != m:
        x = jnp.pad(x, ((0, m_pad - m), (0, 0)))
    rows = m_pad // pack
    x_packed = x.reshape(rows, in_lanes)             # free row-major reshape

    # Packed-row tile: large (amortise ~0.35us grid-step overhead), a multiple
    # of 8 sublanes, clamped to the array and to the VMEM budget.
    tile_p = _round_up(max(tile_rows // pack, 8), 8)
    tile_p = min(tile_p, _round_up(rows, 8))
    in_item = jnp.dtype(x.dtype).itemsize
    w_item = jnp.dtype(w_pack.dtype).itemsize

    def _vmem_bytes(tp):
        return (2 * tp * in_lanes * in_item          # double-buffered input
                + 2 * tp * out_lanes * 4             # double-buffered output
                + w_pack.size * w_item + b_pack.size * 4)

    while tile_p > 8 and _vmem_bytes(tile_p) > _VMEM_BUDGET:
        tile_p = _round_up(tile_p // 2, 8)

    num_tiles = pl.cdiv(rows, tile_p)

    out = pl.pallas_call(
        _linear_bn_kernel,
        out_shape=jax.ShapeDtypeStruct((rows, out_lanes), jnp.float32),
        grid=(num_tiles,),
        in_specs=[
            pl.BlockSpec((tile_p, in_lanes), lambda i: (i, 0)),
            # Folded weight / bias: constant index maps -> fetched once and
            # kept resident in VMEM for the whole grid.
            pl.BlockSpec((in_lanes, out_lanes), lambda i: (0, 0)),
            pl.BlockSpec((1, out_lanes), lambda i: (0, 0)),
        ],
        out_specs=pl.BlockSpec((tile_p, out_lanes), lambda i: (i, 0)),
        compiler_params=pltpu.CompilerParams(
            dimension_semantics=("parallel",),
            vmem_limit_bytes=_VMEM_LIMIT),
    )(x_packed, w_pack, b_pack)

    # Undo the row packing (free reshape) and drop any pack-divisibility pad.
    y = out.reshape(m_pad, d_out)
    return y[:m] if m_pad != m else y


def _linear_bn_ref(x, w, b, gamma, beta, mean, var):
    h = x @ w + b
    return gamma * (h - mean) / jnp.sqrt(var + BN_EPS) + beta


class FeatureEncoderPallas:
    """Node + edge Linear->BatchNorm1d encoders with BN folded at init."""

    def __init__(self, key, node_dim_in, edge_dim_in, dim_inner, dim_edge,
                 *, compute_dtype=jnp.bfloat16):
        ks = jax.random.split(key, 10)
        s = lambda k, shape: jax.random.normal(k, shape, jnp.float32) * 0.1
        # node branch raw params: (W, b, gamma, beta, running_mean, running_var)
        self.node_params = (
            s(ks[0], (node_dim_in, dim_inner)),
            s(ks[1], (dim_inner,)),
            1.0 + s(ks[2], (dim_inner,)),
            s(ks[3], (dim_inner,)),
            s(ks[4], (dim_inner,)),
            1.0 + jnp.abs(s(ks[5], (dim_inner,))),
        )
        # edge branch raw params
        self.edge_params = (
            s(ks[6], (edge_dim_in, dim_edge)),
            s(ks[7], (dim_edge,)),
            1.0 + s(ks[8], (dim_edge,)),
            s(ks[9], (dim_edge,)),
            jnp.zeros((dim_edge,), jnp.float32),
            jnp.ones((dim_edge,), jnp.float32),
        )
        self.compute_dtype = compute_dtype

        # One-time parameter work (hoisted out of the per-call path).
        self._branches = []
        for params, d_out in ((self.node_params, dim_inner),
                              (self.edge_params, dim_edge)):
            w, b, g, bt, mu, var = params
            w_f, b_f = _fold_bn(w, b, g, bt, mu, var)
            pack = _pick_pack(d_out)
            w_pack, b_pack = _pack_linear_params(w_f, b_f, pack, compute_dtype)
            self._branches.append(
                dict(w_pack=w_pack, b_pack=b_pack, d_out=d_out, pack=pack,
                     w_fold=w_f, b_fold=b_f))

    def __call__(self, x, edge_attr, *, tile_rows=1024):
        n, e = self._branches
        x_out = packed_linear_bn(x, n["w_pack"], n["b_pack"], n["d_out"],
                                 n["pack"], tile_rows=tile_rows)
        e_out = packed_linear_bn(edge_attr, e["w_pack"], e["b_pack"],
                                 e["d_out"], e["pack"], tile_rows=tile_rows)
        return x_out, e_out

    # ---------------- references for testing ----------------
    def reference_fp32(self, x, edge_attr):
        return (_linear_bn_ref(x, *self.node_params),
                _linear_bn_ref(edge_attr, *self.edge_params))

    def reference_compute_dtype(self, x, edge_attr):
        """f32 math over operands rounded to the kernel's compute dtype."""
        outs = []
        for inp, br in zip((x, edge_attr), self._branches):
            xr = inp.astype(self.compute_dtype).astype(jnp.float32)
            wr = br["w_fold"].astype(self.compute_dtype).astype(jnp.float32)
            outs.append(xr @ wr + br["b_fold"])
        return tuple(outs)


if __name__ == "__main__":
    key = jax.random.PRNGKey(0)
    k_x, k_e, k_p = jax.random.split(key, 3)

    num_nodes, node_dim_in = 128, 16   # batch.x
    num_edges, edge_dim_in = 256, 8    # batch.edge_attr
    dim_inner = 32                     # cfg.gnn.dim_inner
    dim_edge = 32                      # cfg.gnn.dim_edge

    x = jax.random.normal(k_x, (num_nodes, node_dim_in), jnp.float32)
    edge_attr = jax.random.normal(k_e, (num_edges, edge_dim_in), jnp.float32)

    enc = FeatureEncoderPallas(k_p, node_dim_in, edge_dim_in, dim_inner,
                               dim_edge)

    run = jax.jit(lambda a, b: enc(a, b))
    x_out, e_out = run(x, edge_attr)
    jax.block_until_ready((x_out, e_out))

    assert x_out.shape == (num_nodes, dim_inner)
    assert e_out.shape == (num_edges, dim_edge)

    # Tight check: kernel vs f32 math over bf16-rounded operands (verifies the
    # BN fold, block-diagonal packing and row-pack/unpack logic exactly).
    x_ref_c, e_ref_c = enc.reference_compute_dtype(x, edge_attr)
    assert jnp.allclose(x_out, x_ref_c, atol=1e-4, rtol=1e-3), float(
        jnp.max(jnp.abs(x_out - x_ref_c)))
    assert jnp.allclose(e_out, e_ref_c, atol=1e-4, rtol=1e-3), float(
        jnp.max(jnp.abs(e_out - e_ref_c)))

    # Loose sanity check vs the full-f32 module math (bf16 MXU operands).
    x_ref, e_ref = enc.reference_fp32(x, edge_attr)
    assert jnp.allclose(x_out, x_ref, atol=5e-2, rtol=5e-2)
    assert jnp.allclose(e_out, e_ref, atol=5e-2, rtol=5e-2)

    print("KERNEL_OK")
</pallas_src>

<mosaic_0001>
module attributes {stable_mosaic.version = 11 : i64} {
  func.func @_linear_bn_kernel(%arg0: i32, %arg1: memref<64x32xf32, #tpu.memory_space<vmem>>, %arg2: memref<32x128xbf16, #tpu.memory_space<vmem>>, %arg3: memref<1x128xf32, #tpu.memory_space<vmem>>, %arg4: memref<64x128xf32, #tpu.memory_space<vmem>>) attributes {dimension_semantics = [#tpu.dimension_semantics<parallel>], iteration_bounds = array<i64: 1>, scalar_prefetch = 0 : i64, scratch_operands = 0 : i64, tpu.core_type = #tpu.core_type<tc>, window_params = [{transform_indices = @transform_0, window_bounds = array<i64: 64, 32>}, {pipeline_mode = #tpu.pipeline_mode<synchronous>, transform_indices = @transform_1, window_bounds = array<i64: 32, 128>}, {pipeline_mode = #tpu.pipeline_mode<synchronous>, transform_indices = @transform_2, window_bounds = array<i64: 1, 128>}, {transform_indices = @transform_3, window_bounds = array<i64: 64, 128>}]} {
    %c0 = arith.constant 0 : index
    %c0_0 = arith.constant 0 : index
    %0 = vector.load %arg1[%c0, %c0_0] : memref<64x32xf32, #tpu.memory_space<vmem>>, vector<64x32xf32>
    %1 = arith.truncf %0 : vector<64x32xf32> to vector<64x32xbf16>
    %c0_1 = arith.constant 0 : index
    %c0_2 = arith.constant 0 : index
    %2 = vector.load %arg2[%c0_1, %c0_2] : memref<32x128xbf16, #tpu.memory_space<vmem>>, vector<32x128xbf16>
    %cst = arith.constant dense<0.000000e+00> : vector<64x128xf32>
    %3 = tpu.matmul %1, %2, %cst {dimension_numbers = #tpu.dot_dimension_numbers<[1], [0], [0], [1], [0, 0, 1, 1], [], []>} : vector<64x32xbf16>, vector<32x128xbf16>, vector<64x128xf32> -> vector<64x128xf32>
    %c0_3 = arith.constant 0 : index
    %c0_4 = arith.constant 0 : index
    %4 = vector.load %arg3[%c0_3, %c0_4] : memref<1x128xf32, #tpu.memory_space<vmem>>, vector<1x128xf32>
    %5 = vector.broadcast %4 : vector<1x128xf32> to vector<64x128xf32>
    %6 = arith.addf %3, %5 : vector<64x128xf32>
    %c0_5 = arith.constant 0 : index
    %c0_6 = arith.constant 0 : index
    %7 = vector.load %arg4[%c0_5, %c0_6] : memref<64x128xf32, #tpu.memory_space<vmem>>, vector<64x128xf32>
    tpu.vector_store %arg4[%c0_5, %c0_6], %6 {strides = array<i32>} : memref<64x128xf32, #tpu.memory_space<vmem>>, vector<64x128xf32>,
    return
  }
  func.func @transform_0(%arg0: i32) -> (i32, i32) {
    %c0_i32 = arith.constant 0 : i32
    %c0_i32_0 = arith.constant 0 : i32
    return %arg0, %c0_i32 : i32, i32
  }
  func.func @transform_1(%arg0: i32) -> (i32, i32) {
    %c0_i32 = arith.constant 0 : i32
    %c0_i32_0 = arith.constant 0 : i32
    %c0_i32_1 = arith.constant 0 : i32
    return %c0_i32, %c0_i32_0 : i32, i32
  }
  func.func @transform_2(%arg0: i32) -> (i32, i32) {
    %c0_i32 = arith.constant 0 : i32
    %c0_i32_0 = arith.constant 0 : i32
    %c0_i32_1 = arith.constant 0 : i32
    return %c0_i32, %c0_i32_0 : i32, i32
  }
  func.func @transform_3(%arg0: i32) -> (i32, i32) {
    %c0_i32 = arith.constant 0 : i32
    %c0_i32_0 = arith.constant 0 : i32
    return %arg0, %c0_i32 : i32, i32
  }
}

module attributes {stable_mosaic.version = 11 : i64} {
  func.func @_linear_bn_kernel(%arg0: i32, %arg1: memref<32x64xf32, #tpu.memory_space<vmem>>, %arg2: memref<64x128xbf16, #tpu.memory_space<vmem>>, %arg3: memref<1x128xf32, #tpu.memory_space<vmem>>, %arg4: memref<32x128xf32, #tpu.memory_space<vmem>>) attributes {dimension_semantics = [#tpu.dimension_semantics<parallel>], iteration_bounds = array<i64: 1>, scalar_prefetch = 0 : i64, scratch_operands = 0 : i64, tpu.core_type = #tpu.core_type<tc>, window_params = [{transform_indices = @transform_0, window_bounds = array<i64: 32, 64>}, {pipeline_mode = #tpu.pipeline_mode<synchronous>, transform_indices = @transform_1, window_bounds = array<i64: 64, 128>}, {pipeline_mode = #tpu.pipeline_mode<synchronous>, transform_indices = @transform_2, window_bounds = array<i64: 1, 128>}, {transform_indices = @transform_3, window_bounds = array<i64: 32, 128>}]} {
    %c0 = arith.constant 0 : index
    %c0_0 = arith.constant 0 : index
    %0 = vector.load %arg1[%c0, %c0_0] : memref<32x64xf32, #tpu.memory_space<vmem>>, vector<32x64xf32>
    %1 = arith.truncf %0 : vector<32x64xf32> to vector<32x64xbf16>
    %c0_1 = arith.constant 0 : index
    %c0_2 = arith.constant 0 : index
    %2 = vector.load %arg2[%c0_1, %c0_2] : memref<64x128xbf16, #tpu.memory_space<vmem>>, vector<64x128xbf16>
    %cst = arith.constant dense<0.000000e+00> : vector<32x128xf32>
    %3 = tpu.matmul %1, %2, %cst {dimension_numbers = #tpu.dot_dimension_numbers<[1], [0], [0], [1], [0, 0, 1, 1], [], []>} : vector<32x64xbf16>, vector<64x128xbf16>, vector<32x128xf32> -> vector<32x128xf32>
    %c0_3 = arith.constant 0 : index
    %c0_4 = arith.constant 0 : index
    %4 = vector.load %arg3[%c0_3, %c0_4] : memref<1x128xf32, #tpu.memory_space<vmem>>, vector<1x128xf32>
    %5 = vector.broadcast %4 : vector<1x128xf32> to vector<32x128xf32>
    %6 = arith.addf %3, %5 : vector<32x128xf32>
    %c0_5 = arith.constant 0 : index
    %c0_6 = arith.constant 0 : index
    %7 = vector.load %arg4[%c0_5, %c0_6] : memref<32x128xf32, #tpu.memory_space<vmem>>, vector<32x128xf32>
    tpu.vector_store %arg4[%c0_5, %c0_6], %6 {strides = array<i32>} : memref<32x128xf32, #tpu.memory_space<vmem>>, vector<32x128xf32>,
    return
  }
  func.func @transform_0(%arg0: i32) -> (i32, i32) {
    %c0_i32 = arith.constant 0 : i32
    %c0_i32_0 = arith.constant 0 : i32
    return %arg0, %c0_i32 : i32, i32
  }
  func.func @transform_1(%arg0: i32) -> (i32, i32) {
    %c0_i32 = arith.constant 0 : i32
    %c0_i32_0 = arith.constant 0 : i32
    %c0_i32_1 = arith.constant 0 : i32
    return %c0_i32, %c0_i32_0 : i32, i32
  }
  func.func @transform_2(%arg0: i32) -> (i32, i32) {
    %c0_i32 = arith.constant 0 : i32
    %c0_i32_0 = arith.constant 0 : i32
    %c0_i32_1 = arith.constant 0 : i32
    return %c0_i32, %c0_i32_0 : i32, i32
  }
  func.func @transform_3(%arg0: i32) -> (i32, i32) {
    %c0_i32 = arith.constant 0 : i32
    %c0_i32_0 = arith.constant 0 : i32
    return %arg0, %c0_i32 : i32, i32
  }
}

</mosaic_0001>

<bundles_post_ra>
// kernel: _lambda_.3
= control target key start
LH: loop header
LB: loop body
LE: loop exit
PB: predicated region body
PF: predicated region fallthrough
CT: control target
= control target key end

     0   :  { %vm50_vm0 = vcmask 261120   ;;  %s252_s1 = inlined_call_operand.vmem [shape: bf16[32,128], index: 1, kind: input, shape index: {}]   ;;  %s253_s0 = inlined_call_operand.vmem [shape: f32[64,32], index: 0, kind: input, shape index: {}]   ;;  %s254_s2 = inlined_call_operand.vmem [shape: f32[1,128], index: 2, kind: input, shape index: {}]   ;;  %s255_s3 = inlined_call_operand.vmem [shape: f32[64,128], index: 3, kind: output, shape index: {}]  }
   0x1   :  { %v169_v0 = vld [vmem:[%s252_s1 + $0x8] sm:$0xff]   ;;  %v170_v1 = vld [vmem:[%s252_s1] sm:$0xff]   ;;  %v17_v7 = vld [vmem:[%s253_s0 + $0x10] sm:$0xff] }
   0x2   :  { %153 = vmatprep.subr.bf16.mxu0 %v169_v0  ;;  %165 = vmatprep.subr.bf16.mxu1 %v169_v0  ;;  %v15_v2 = vld [vmem:[%s253_s0] sm:$0xff]  ;;  %v16_v3 = vld [vmem:[%s253_s0 + $0x8] sm:$0xff]  ;;  %v18_v8 = vld [vmem:[%s253_s0 + $0x18] sm:$0xff] }
   0x3   :  { %v19_v4 = vld [vmem:[%s253_s0 + $0x20] sm:$0xff]  ;;  %154 = vmatpush3.bf16.msra.mxu0 %v169_v0  ;;  %167 = vmatpush3.bf16.msra.mxu1 %v169_v0  ;;  %v23_v5 = vpack.c.bf16 %v16_v3, %v15_v2  ;;  %v20_v6 = vld [vmem:[%s253_s0 + $0x28] sm:$0xff]  ;;  %v21_v10 = vld [vmem:[%s253_s0 + $0x30] sm:$0xff]  ;;  %v24_v12 = vpack.c.bf16 %v18_v8, %v17_v7 }
   0x4   :  { %155 = vmatprep.subr.bf16.mxu0 %v170_v1  ;;  %166 = vmatprep.subr.bf16.mxu1 %v170_v1  ;;  %v25_v9 = vpack.c.bf16 %v20_v6, %v19_v4  ;;  %v22_v11 = vld [vmem:[%s253_s0 + $0x38] sm:$0xff]  ;;  %v140_v14 = vld [vmem:[%s254_s2] ss:$0 sm:$0xff] }
   0x5   :  { %157 = vmatprep.mubr.msk.bf16.mxu0 %vm50_vm0, %v23_v5  ;;  %v26_v13 = vpack.c.bf16 %v22_v11, %v21_v10 }
   0x6   :  { %161 = vmatprep.mubr.msk.bf16.mxu1 %vm50_vm0, %v25_v9 }
   0x7   :  { %156 = vmatpush3.bf16.msra.mxu0 %v170_v1  ;;  %168 = vmatpush3.bf16.msra.mxu1 %v170_v1 }
   0xa   :  { %158 = vmatmul.mubr.msk.bf16.vlgmr.msra.gmra.mxu0 %vm50_vm0, %v24_v12  ;;  %162 = vmatmul.mubr.msk.bf16.vlgmr.msra.gmra.mxu1 %vm50_vm0, %v26_v13 }
  0xca   :  { %v159_v15 = vpop.f32.mrf.mxu0  ;;  %v163_v16 = vpop.f32.mrf.mxu1 }
  0xcb   :  { %v106_v17 = vadd.f32 %v159_v15, %v140_v14  ;;  %v122_v18 = vadd.f32 %v163_v16, %v140_v14 }
  0xcc   :  { %v97_v19 = vpop.f32.mrf.mxu0  ;;  %v113_v20 = vpop.f32.mrf.mxu1 }
  0xcd   :  { %130 = vst [vmem:[%s255_s3 + $0x10] sm:$0xff] %v106_v17  ;;  %134 = vst [vmem:[%s255_s3 + $0x30] sm:$0xff] %v122_v18  ;;  %v98_v21 = vadd.f32 %v140_v14, %v97_v19  ;;  %v114_v22 = vadd.f32 %v140_v14, %v113_v20 }
  0xce   :  { %v160_v23 = vpop.f32.mrf.mxu0  ;;  %v164_v24 = vpop.f32.mrf.mxu1 }
  0xcf   :  { %128 = vst [vmem:[%s255_s3] sm:$0xff] %v98_v21  ;;  %132 = vst [vmem:[%s255_s3 + $0x20] sm:$0xff] %v114_v22  ;;  %v109_v25 = vadd.f32 %v160_v23, %v140_v14  ;;  %v125_v26 = vadd.f32 %v164_v24, %v140_v14 }
  0xd0   :  { %v100_v27 = vpop.f32.mrf.mxu0  ;;  %v116_v28 = vpop.f32.mrf.mxu1 }
  0xd1   :  { %131 = vst [vmem:[%s255_s3 + $0x18] sm:$0xff] %v109_v25  ;;  %135 = vst [vmem:[%s255_s3 + $0x38] sm:$0xff] %v125_v26  ;;  %v101_v29 = vadd.f32 %v140_v14, %v100_v27  ;;  %v117_v30 = vadd.f32 %v140_v14, %v116_v28 }
  0xd3   :  { %129 = vst [vmem:[%s255_s3 + $0x8] sm:$0xff] %v101_v29  ;;  %133 = vst [vmem:[%s255_s3 + $0x28] sm:$0xff] %v117_v30 }

// kernel: _lambda_.2
= control target key start
LH: loop header
LB: loop body
LE: loop exit
PB: predicated region body
PF: predicated region fallthrough
CT: control target
= control target key end

     0   :  { %vm60_vm0 = vcmask 523264   ;;  %s212_s1 = inlined_call_operand.vmem [shape: bf16[64,128], index: 1, kind: input, shape index: {}]   ;;  %s213_s0 = inlined_call_operand.vmem [shape: f32[32,64], index: 0, kind: input, shape index: {}]   ;;  %s214_s2 = inlined_call_operand.vmem [shape: f32[1,128], index: 2, kind: input, shape index: {}]   ;;  %s215_s3 = inlined_call_operand.vmem [shape: f32[32,128], index: 3, kind: output, shape index: {}]  }
   0x1   :  { %v149_v0 = vld [vmem:[%s212_s1 + $0x18] sm:$0xff]   ;;  %v150_v1 = vld [vmem:[%s212_s1 + $0x10] sm:$0xff]   ;;  %v151_v2 = vld [vmem:[%s212_s1 + $0x8] sm:$0xff]  }
   0x2   :  { %137 = vmatprep.subr.bf16.mxu0 %v149_v0  ;;  %v15_v3 = vld [vmem:[%s213_s0] sm:$0xff]  ;;  %v16_v4 = vld [vmem:[%s213_s0 + $0x8] sm:$0xff]  ;;  %v17_v7 = vld [vmem:[%s213_s0 + $0x10] sm:$0xff] }
   0x3   :  { %138 = vmatpush3.bf16.msra.mxu0 %v149_v0  ;;  %v19_v5 = vpack.c.bf16 %v16_v4, %v15_v3  ;;  %v152_v6 = vld [vmem:[%s212_s1] sm:$0xff]   ;;  %v18_v8 = vld [vmem:[%s213_s0 + $0x18] sm:$0xff] }
   0x4   :  { %139 = vmatprep.subr.bf16.mxu0 %v150_v1  ;;  %v20_v9 = vpack.c.bf16 %v18_v8, %v17_v7  ;;  %v124_v10 = vld [vmem:[%s214_s2] ss:$0 sm:$0xff] }
   0x5   :  { %145 = vmatprep.mubr.msk.bf16.mxu0 %vm60_vm0, %v19_v5 }
   0x7   :  { %140 = vmatpush3.bf16.msra.mxu0 %v150_v1 }
   0x8   :  { %141 = vmatprep.subr.bf16.mxu0 %v151_v2 }
   0xb   :  { %142 = vmatpush3.bf16.msra.mxu0 %v151_v2 }
   0xc   :  { %143 = vmatprep.subr.bf16.mxu0 %v152_v6 }
   0xf   :  { %144 = vmatpush3.bf16.msra.mxu0 %v152_v6 }
  0x12   :  { %146 = vmatmul.mubr.msk.bf16.vlgmr.msra.gmra.mxu0 %vm60_vm0, %v20_v9 }
  0xd2   :  { %v147_v11 = vpop.f32.mrf.mxu0 }
  0xd3   :  { %v110_v12 = vadd.f32 %v147_v11, %v124_v10 }
  0xd4   :  { %v101_v13 = vpop.f32.mrf.mxu0 }
  0xd5   :  { %118 = vst [vmem:[%s215_s3 + $0x10] sm:$0xff] %v110_v12  ;;  %v102_v14 = vadd.f32 %v124_v10, %v101_v13 }
  0xd6   :  { %v148_v15 = vpop.f32.mrf.mxu0 }
  0xd7   :  { %116 = vst [vmem:[%s215_s3] sm:$0xff] %v102_v14  ;;  %v113_v16 = vadd.f32 %v148_v15, %v124_v10 }
  0xd8   :  { %v104_v17 = vpop.f32.mrf.mxu0 }
  0xd9   :  { %119 = vst [vmem:[%s215_s3 + $0x18] sm:$0xff] %v113_v16  ;;  %v105_v18 = vadd.f32 %v124_v10, %v104_v17 }
  0xdb   :  { %117 = vst [vmem:[%s215_s3 + $0x8] sm:$0xff] %v105_v18 }

</bundles_post_ra>
